<compile_context>
chip_gen: v5e
topology: v5e:2x2
jax: 0.10.0
libtpu: 0.0.40
codegen_flags: <defaults>
</compile_context>

<pallas_src>
import jax
import jax.numpy as jnp
from jax.experimental import pallas as pl
from jax.experimental.pallas import tpu as pltpu


LANES = 128
TARGET_TILE_BYTES = 4 * 1024 * 1024   # ~4 MiB x-tile per grid step (v7x-friendly)
VMEM_LIMIT_BYTES = 32 * 1024 * 1024   # safe on v5e/v6e (128 MiB) and v7x (64 MiB)
_SUBLANES = {4: 8, 2: 16, 1: 32}      # packed sublane granularity by itemsize


def _normalize_kernel(x_ref, inv_ref, o_ref):
    # x_ref:   (tile_rows, 128)  input tile
    # inv_ref: (tile_rows, 1)    per-row f32 reciprocal of coef
    # o_ref:   (tile_rows, 128)  output tile
    x = x_ref[...].astype(jnp.float32)          # no-op for f32 inputs
    o_ref[...] = (x * inv_ref[...]).astype(o_ref.dtype)


def _pick_tile_rows(total_rows, sublane, target_rows):
    """Sublane-multiple tile size near `target_rows`, preferring exact divisors."""
    if total_rows <= target_rows:
        return ((total_rows + sublane - 1) // sublane) * sublane
    lo = max(sublane, (target_rows // 2 // sublane) * sublane)
    cand = (target_rows // sublane) * sublane
    while cand >= lo:
        if total_rows % cand == 0:
            return cand          # exact divisor -> every tile full, no masked tail
        cand -= sublane
    return (target_rows // sublane) * sublane   # ragged tail gets padded in wrapper


def normalize(x, coef):
    """Pallas equivalent of: x / coef.reshape(-1, 1, 1, 1) (x is NCHW-like)."""
    orig_shape = x.shape
    B = x.shape[0]
    coef = coef.reshape(-1).astype(jnp.float32)
    assert coef.shape[0] == B, "coef must have one entry per batch element"

    # Match PyTorch promotion: integer / float -> float.
    out_dtype = x.dtype if jnp.issubdtype(x.dtype, jnp.floating) else jnp.float32

    chw = 1
    for d in x.shape[1:]:
        chw *= d

    in_size = jnp.dtype(x.dtype).itemsize
    out_size = jnp.dtype(out_dtype).itemsize
    sublane = max(_SUBLANES.get(in_size, 8), _SUBLANES.get(out_size, 8))
    target_rows = TARGET_TILE_BYTES // (LANES * max(in_size, out_size))
    target_rows = max(sublane, (target_rows // sublane) * sublane)

    # ---- Lane-dense, batch-fused (rows, 128) layout -------------------------
    # Pad CHW up to a lane multiple so the lane-dense path always applies.
    x2 = x.reshape(B, chw)
    chw_p = ((chw + LANES - 1) // LANES) * LANES
    if chw_p != chw:
        x2 = jnp.pad(x2, ((0, 0), (0, chw_p - chw)))
    rows_per_b = chw_p // LANES
    total_rows = B * rows_per_b

    tile_rows = _pick_tile_rows(total_rows, sublane, target_rows)
    n_tiles = pl.cdiv(total_rows, tile_rows)
    rows_p = n_tiles * tile_rows

    x3 = x2.reshape(total_rows, LANES)
    if rows_p != total_rows:
        x3 = jnp.pad(x3, ((0, rows_p - total_rows), (0, 0)))

    # Per-row reciprocal column: lets tiles cross batch boundaries freely.
    inv_rows = jnp.repeat(1.0 / coef, rows_per_b)
    if rows_p != total_rows:
        inv_rows = jnp.pad(inv_rows, (0, rows_p - total_rows), constant_values=1.0)
    inv_rows = inv_rows.reshape(rows_p, 1)

    # TODO(synk): alias x3 -> out (input_output_aliases) when the caller can
    # donate x for in-place normalization; sweep pl.Buffered(3) if tiles shrink.
    out = pl.pallas_call(
        _normalize_kernel,
        out_shape=jax.ShapeDtypeStruct((rows_p, LANES), out_dtype),
        grid_spec=pltpu.PrefetchScalarGridSpec(
            num_scalar_prefetch=0,
            grid=(n_tiles,),
            in_specs=[
                pl.BlockSpec((tile_rows, LANES), lambda i: (i, 0)),
                pl.BlockSpec((tile_rows, 1), lambda i: (i, 0)),
            ],
            out_specs=pl.BlockSpec((tile_rows, LANES), lambda i: (i, 0)),
        ),
        compiler_params=pltpu.CompilerParams(
            dimension_semantics=("parallel",),
            vmem_limit_bytes=VMEM_LIMIT_BYTES,
        ),
    )(x3, inv_rows)

    out = out[:total_rows].reshape(B, chw_p)[:, :chw].reshape(orig_shape)
    return out


if __name__ == "__main__":
    key = jax.random.PRNGKey(0)
    kx, kc = jax.random.split(key)

    B, C, H, W = 2, 4, 16, 16
    x = jax.random.normal(kx, (B, C, H, W), dtype=jnp.float32)
    # Strictly positive, deterministic normalization coefficients.
    coef = jax.random.uniform(kc, (B,), dtype=jnp.float32, minval=0.5, maxval=2.0)

    out = normalize(x, coef)
    out = jax.block_until_ready(out)

    # Reference (pure JAX) check of the PyTorch semantics.
    ref = x / coef.reshape(-1, 1, 1, 1)
    assert out.shape == x.shape and out.dtype == x.dtype
    assert jnp.allclose(out, ref, rtol=1e-6, atol=1e-6)

    print("KERNEL_OK")
</pallas_src>

<mosaic_0001>
module attributes {stable_mosaic.version = 11 : i64} {
  func.func @_normalize_kernel(%arg0: i32, %arg1: memref<16x128xf32, #tpu.memory_space<vmem>>, %arg2: memref<16x1xf32, #tpu.memory_space<vmem>>, %arg3: memref<16x128xf32, #tpu.memory_space<vmem>>) attributes {dimension_semantics = [#tpu.dimension_semantics<parallel>], iteration_bounds = array<i64: 1>, scalar_prefetch = 0 : i64, scratch_operands = 0 : i64, tpu.core_type = #tpu.core_type<tc>, window_params = [{transform_indices = @transform_0, window_bounds = array<i64: 16, 128>}, {transform_indices = @transform_1, window_bounds = array<i64: 16, 1>}, {transform_indices = @transform_2, window_bounds = array<i64: 16, 128>}]} {
    %c0 = arith.constant 0 : index
    %c0_0 = arith.constant 0 : index
    %0 = vector.load %arg1[%c0, %c0_0] : memref<16x128xf32, #tpu.memory_space<vmem>>, vector<16x128xf32>
    %c0_1 = arith.constant 0 : index
    %c0_2 = arith.constant 0 : index
    %1 = vector.load %arg2[%c0_1, %c0_2] : memref<16x1xf32, #tpu.memory_space<vmem>>, vector<16x1xf32>
    %2 = vector.broadcast %1 : vector<16x1xf32> to vector<16x128xf32>
    %3 = arith.mulf %0, %2 : vector<16x128xf32>
    %c0_3 = arith.constant 0 : index
    %c0_4 = arith.constant 0 : index
    %4 = vector.load %arg3[%c0_3, %c0_4] : memref<16x128xf32, #tpu.memory_space<vmem>>, vector<16x128xf32>
    tpu.vector_store %arg3[%c0_3, %c0_4], %3 {strides = array<i32>} : memref<16x128xf32, #tpu.memory_space<vmem>>, vector<16x128xf32>,
    return
  }
  func.func @transform_0(%arg0: i32) -> (i32, i32) {
    %c0_i32 = arith.constant 0 : i32
    %c0_i32_0 = arith.constant 0 : i32
    return %arg0, %c0_i32 : i32, i32
  }
  func.func @transform_1(%arg0: i32) -> (i32, i32) {
    %c0_i32 = arith.constant 0 : i32
    %c0_i32_0 = arith.constant 0 : i32
    return %arg0, %c0_i32 : i32, i32
  }
  func.func @transform_2(%arg0: i32) -> (i32, i32) {
    %c0_i32 = arith.constant 0 : i32
    %c0_i32_0 = arith.constant 0 : i32
    return %arg0, %c0_i32 : i32, i32
  }
}

</mosaic_0001>

<bundles_post_ra>
// kernel: tpu_custom_call.1
= control target key start
LH: loop header
LB: loop body
LE: loop exit
PB: predicated region body
PF: predicated region fallthrough
CT: control target
= control target key end

     0   :  { %s113_s0 = inlined_call_operand.vmem [shape: f32[16,128], index: 0, kind: input, shape index: {}]   ;;  %s114_s1 = inlined_call_operand.vmem [shape: f32[16,1], index: 1, kind: input, shape index: {}]   ;;  %s115_s2 = inlined_call_operand.hbm [shape: f32[16,128], index: 2, kind: output, shape index: {}]  }
   0x1   :  { %v14_v0 = vld [vmem:[%s114_s1] sm:$0xff] }
   0x2   :  { %7 = vsyncpa [#allocation3], 0  ;;  %v79_v1 = vmov 0   ;;  %v15_v2 = vld [vmem:[%s114_s1 + $0x8] sm:$0xff]  ;;  %v12_v3 = vld [vmem:[%s113_s0] sm:$0xff]  ;;  %s80_s15 = smov [#allocation2]  }
   0x3   :  { %52 = vset.pattern.permute.xlu0 %v79_v1  ;;  %s34_s16 = sshll.u32 %s80_s15, 4  ;;  %s36_s19 = sshll.u32 %s115_s2, 4  ;;  %v13_v6 = vld [vmem:[%s113_s0 + $0x8] sm:$0xff]  ;;  %s35_s16 = int_to_ptr.vmem [resolvable:$true] %s34_s16  ;;  %s37_s19 = int_to_ptr.hbm [resolvable:$true] %s36_s19 }
   0x4   :  { %18 = vperm.xlu0 %52, %v14_v0   ;;  %s81_s1 = smov 128   ;;  %s82_s22 = smov 8  }
   0xc   :  { %23 = vperm.xlu0 %52, %v15_v2  }
  0x76   :  { %v19_v4 = vpop.permute.xlu0 %18 }
  0x77   :  { %v26_v5 = vmul.f32 %v19_v4, %v12_v3 }
  0x79   :  { %28 = vst [vmem:[#allocation2] sm:$0xff] %v26_v5 }
  0x7e   :  { %v24_v7 = vpop.permute.xlu0 %23 }
  0x7f   :  { %v27_v8 = vmul.f32 %v24_v7, %v13_v6 }
  0x81   :  { %29 = vst [vmem:[#allocation2 + $0x8] sm:$0xff] %v27_v8 }
  0x82   :  { %42 = dma.vmem_to_hbm [thread:$0]  %s35_s16, 256, %s37_s19, [#allocation3], %s81_s1, %s81_s1, %s82_s22  }
  0x83   :  { %77 = dma.done.wait [#allocation3], 256  }
  0x84   :  { %78 = vsyncadd [#allocation3], 4294967040 }
  0x85   :  { %47 = vsyncpa [#allocation3], 1 }

</bundles_post_ra>
